<compile_context>
chip_gen: v6e
topology: v6e:2x2x1
jax: 0.10.0
libtpu: 0.0.40
codegen_flags: <defaults>
</compile_context>

<pallas_src>
import numpy as np
import jax
import jax.numpy as jnp
from jax.experimental import pallas as pl
from jax.experimental.pallas import tpu as pltpu

NUM_CLASSES = 20                 # len(Config['Classes']) -- VOC-style
D = 5 + NUM_CLASSES              # cx, cy, w, h, obj, class scores
D_OUT = 4 + NUM_CLASSES          # x1, y1, x2, y2, class scores*obj  (24 rows)
CONFIDENCE = 0.1
IOU_THRESHOLD = 0.5


def yolo_decode_kernel(pred_ref, out_ref):
    # pred_ref: (D, tile_n) f32, channel-first, lane-dense.
    # out_ref:  (D_OUT, tile_n) f32: rows 0-3 = xyxy boxes, rows 4.. = scores.
    c = pred_ref[0:2, :]                 # (2, tile_n) -> cx, cy
    s = pred_ref[2:4, :]                 # (2, tile_n) -> w, h
    half = 0.5 * s
    # c_box_to_b_box followed by clip_boxes_to_image(boxes, (1, 1))
    out_ref[0:2, :] = jnp.clip(c - half, 0.0, 1.0)   # x1, y1
    out_ref[2:4, :] = jnp.clip(c + half, 0.0, 1.0)   # x2, y2

    obj = pred_ref[4:5, :]               # (1, tile_n)
    out_ref[4:, :] = pred_ref[5:, :] * obj           # scores = cls * objectness


def _choose_tile_n(n, max_tile=4096, min_tile=128):
    """Largest lane-aligned tile (<= max_tile) keeping >= 2 grid steps."""
    half = pl.cdiv(n, 2)                 # aim for >= 2 steps (v7x has 2 TCs)
    t = 128 * pl.cdiv(half, 128)         # lane aligned (multiple of 128)
    return int(max(min_tile, min(t, max_tile)))


def yolo_decode_fused(pred_flat, tile_n=None):
    """pred_flat: (N, D) float32.

    Returns (out_t, N) where out_t is the fused, channel-first, lane-padded
    device array of shape (D_OUT, N_pad): rows 0-3 xyxy boxes, rows 4..23
    per-class scores.  Caller slices [:, :N] (a host-side numpy view).
    """
    n, d = pred_flat.shape
    assert d == D
    if tile_n is None:
        tile_n = _choose_tile_n(n)
    n_pad = int(pl.cdiv(n, tile_n)) * tile_n

    # Channel-first layout: lane (fast, 128-wide) axis = flattened predictions.
    pred_t = jnp.asarray(pred_flat, jnp.float32).T       # (D, N)
    if n_pad != n:
        pred_t = jnp.pad(pred_t, ((0, 0), (0, n_pad - n)))

    out_t = pl.pallas_call(
        yolo_decode_kernel,
        out_shape=jax.ShapeDtypeStruct((D_OUT, n_pad), jnp.float32),
        grid_spec=pltpu.PrefetchScalarGridSpec(
            num_scalar_prefetch=0,
            grid=(n_pad // tile_n,),
            in_specs=[pl.BlockSpec((D, tile_n), lambda i: (0, i))],
            out_specs=pl.BlockSpec((D_OUT, tile_n), lambda i: (0, i)),
        ),
        compiler_params=pltpu.CompilerParams(
            dimension_semantics=("parallel",)),
    )(pred_t)
    return out_t, n


def _nms_numpy(boxes, scores, iou_threshold):
    """torchvision.ops.nms semantics: greedy, keep IoU <= threshold."""
    x1, y1, x2, y2 = boxes[:, 0], boxes[:, 1], boxes[:, 2], boxes[:, 3]
    areas = (x2 - x1) * (y2 - y1)
    order = np.argsort(-scores, kind="stable")
    keep = []
    while order.size > 0:
        i = order[0]
        keep.append(i)
        rest = order[1:]
        xx1 = np.maximum(x1[i], x1[rest])
        yy1 = np.maximum(y1[i], y1[rest])
        xx2 = np.minimum(x2[i], x2[rest])
        yy2 = np.minimum(y2[i], y2[rest])
        inter = np.clip(xx2 - xx1, 0.0, None) * np.clip(yy2 - yy1, 0.0, None)
        iou = inter / (areas[i] + areas[rest] - inter + 1e-12)
        order = rest[iou <= iou_threshold]
    return np.asarray(keep, dtype=np.int64)


def yolo_predict_forward(pred):
    """Mirrors YOLOPredict.forward.  pred: (..., D) array."""
    pred_flat = jnp.asarray(pred, jnp.float32).reshape(-1, D)
    out_t, n = yolo_decode_fused(pred_flat)
    out_np = np.asarray(jax.block_until_ready(out_t))   # (D_OUT, N_pad)

    boxes = out_np[:4, :n].T         # (N, 4) numpy view (no device transpose)
    scores = out_np[4:, :n]          # (NUM_CLASSES, N), channel-first

    # TODO(synk): per-class thresholding + greedy NMS produce dynamic shapes and
    # have no clean Pallas equivalent; done host-side in numpy.
    p_boxes, p_labels, p_scores = [], [], []
    for cl in range(NUM_CLASSES):
        cl_scores_all = scores[cl]
        cl_idx = cl_scores_all > CONFIDENCE
        if not np.any(cl_idx):
            continue
        cl_box = boxes[cl_idx]
        cl_scores = cl_scores_all[cl_idx]
        keep = _nms_numpy(cl_box, cl_scores, IOU_THRESHOLD)
        p_boxes.append(cl_box[keep])
        p_labels.append(np.full(keep.shape, cl, dtype=np.int64))
        p_scores.append(cl_scores[keep])

    if not p_boxes:
        return []
    return [{
        "boxes": np.concatenate(p_boxes),
        "labels": np.concatenate(p_labels),
        "scores": np.concatenate(p_scores),
    }]


if __name__ == "__main__":
    key = jax.random.PRNGKey(0)
    # batch=2, anchors=3, grid 8x8, channels = 5 + NUM_CLASSES
    # -> N = 2*3*8*8 = 384 flattened predictions (padded to the lane tile).
    pred = jax.random.normal(key, (2, 3, 8, 8, D), dtype=jnp.float32)

    # run the Pallas kernel once and block on its result
    out_t, n = yolo_decode_fused(pred.reshape(-1, D))
    jax.block_until_ready(out_t)
    out_np = np.asarray(out_t)
    boxes = out_np[:4, :n].T
    scores = out_np[4:, :n].T

    # full forward (kernel + host-side NMS glue), for semantic parity
    out = yolo_predict_forward(pred)

    assert boxes.shape == (2 * 3 * 8 * 8, 4)
    assert scores.shape == (2 * 3 * 8 * 8, NUM_CLASSES)
    assert np.all(boxes >= 0.0) and np.all(boxes <= 1.0)
    if out:
        assert out[0]["boxes"].shape[0] == out[0]["labels"].shape[0] == out[0]["scores"].shape[0]

    print("KERNEL_OK")
</pallas_src>

<mosaic_0001>
module attributes {stable_mosaic.version = 11 : i64} {
  func.func @yolo_decode_kernel(%arg0: i32, %arg1: memref<25x256xf32, #tpu.memory_space<vmem>>, %arg2: memref<24x256xf32, #tpu.memory_space<vmem>>) attributes {dimension_semantics = [#tpu.dimension_semantics<parallel>], iteration_bounds = array<i64: 2>, scalar_prefetch = 0 : i64, scratch_operands = 0 : i64, tpu.core_type = #tpu.core_type<tc>, window_params = [{transform_indices = @transform_0, window_bounds = array<i64: 25, 256>}, {transform_indices = @transform_1, window_bounds = array<i64: 24, 256>}]} {
    %c0 = arith.constant 0 : index
    %c0_0 = arith.constant 0 : index
    %0 = vector.load %arg1[%c0, %c0_0] : memref<25x256xf32, #tpu.memory_space<vmem>>, vector<2x256xf32>
    %c2 = arith.constant 2 : index
    %c0_1 = arith.constant 0 : index
    %1 = vector.load %arg1[%c2, %c0_1] : memref<25x256xf32, #tpu.memory_space<vmem>>, vector<2x256xf32>
    %cst = arith.constant 5.000000e-01 : f32
    %2 = vector.broadcast %cst : f32 to vector<2x256xf32>
    %3 = arith.mulf %2, %1 : vector<2x256xf32>
    %4 = arith.subf %0, %3 : vector<2x256xf32>
    %cst_2 = arith.constant 0.000000e+00 : f32
    %cst_3 = arith.constant 1.000000e+00 : f32
    %5 = vector.broadcast %cst_2 : f32 to vector<2x256xf32>
    %6 = arith.maximumf %5, %4 : vector<2x256xf32>
    %7 = vector.broadcast %cst_3 : f32 to vector<2x256xf32>
    %8 = arith.minimumf %7, %6 : vector<2x256xf32>
    %c0_4 = arith.constant 0 : index
    %c0_5 = arith.constant 0 : index
    %9 = vector.load %arg2[%c0_4, %c0_5] : memref<24x256xf32, #tpu.memory_space<vmem>>, vector<2x256xf32>
    tpu.vector_store %arg2[%c0_4, %c0_5], %8 {strides = array<i32>} : memref<24x256xf32, #tpu.memory_space<vmem>>, vector<2x256xf32>,
    %10 = arith.addf %0, %3 : vector<2x256xf32>
    %cst_6 = arith.constant 0.000000e+00 : f32
    %cst_7 = arith.constant 1.000000e+00 : f32
    %11 = vector.broadcast %cst_6 : f32 to vector<2x256xf32>
    %12 = arith.maximumf %11, %10 : vector<2x256xf32>
    %13 = vector.broadcast %cst_7 : f32 to vector<2x256xf32>
    %14 = arith.minimumf %13, %12 : vector<2x256xf32>
    %c2_8 = arith.constant 2 : index
    %c0_9 = arith.constant 0 : index
    %15 = vector.load %arg2[%c2_8, %c0_9] : memref<24x256xf32, #tpu.memory_space<vmem>>, vector<2x256xf32>
    tpu.vector_store %arg2[%c2_8, %c0_9], %14 {strides = array<i32>} : memref<24x256xf32, #tpu.memory_space<vmem>>, vector<2x256xf32>,
    %c4 = arith.constant 4 : index
    %c0_10 = arith.constant 0 : index
    %16 = vector.load %arg1[%c4, %c0_10] : memref<25x256xf32, #tpu.memory_space<vmem>>, vector<1x256xf32>
    %c5 = arith.constant 5 : index
    %c0_11 = arith.constant 0 : index
    %17 = vector.load %arg1[%c5, %c0_11] : memref<25x256xf32, #tpu.memory_space<vmem>>, vector<20x256xf32>
    %18 = vector.broadcast %16 : vector<1x256xf32> to vector<20x256xf32>
    %19 = arith.mulf %17, %18 : vector<20x256xf32>
    %c4_12 = arith.constant 4 : index
    %c0_13 = arith.constant 0 : index
    %20 = vector.load %arg2[%c4_12, %c0_13] : memref<24x256xf32, #tpu.memory_space<vmem>>, vector<20x256xf32>
    tpu.vector_store %arg2[%c4_12, %c0_13], %19 {strides = array<i32>} : memref<24x256xf32, #tpu.memory_space<vmem>>, vector<20x256xf32>,
    return
  }
  func.func @transform_0(%arg0: i32) -> (i32, i32) {
    %c0_i32 = arith.constant 0 : i32
    %c0_i32_0 = arith.constant 0 : i32
    return %c0_i32, %arg0 : i32, i32
  }
  func.func @transform_1(%arg0: i32) -> (i32, i32) {
    %c0_i32 = arith.constant 0 : i32
    %c0_i32_0 = arith.constant 0 : i32
    return %c0_i32, %arg0 : i32, i32
  }
}

</mosaic_0001>

<bundles_post_ra>
// kernel: tpu_custom_call.1
= control target key start
LH: loop header
LB: loop body
LE: loop exit
PB: predicated region body
PF: predicated region fallthrough
CT: control target
= control target key end

     0   :  { %6 = vsyncpa [#allocation3], 0  ;;  %s682_s0 = inlined_call_operand.hbm [shape: f32[25,512], index: 0, kind: input, shape index: {}]   ;;  %s683_s1 = inlined_call_operand.hbm [shape: f32[24,512], index: 1, kind: output, shape index: {}]  }
   0x1   :  { %8 = vsyncpa [#allocation3 + $0x1], 0 }
   0x2   :  { %9 = vsyncpa [#allocation4], 0 }
   0x3   :  { %11 = vsyncpa [#allocation4 + $0x1], 0  ;;  %s502_s6 = smov 0   ;;  %s504_s7 = smov 0  }
   0x4   :  { %s506_s8 = smov 0   ;;  %s508_s9 = smov 0  }
   0x5 LB: > { %s523_s10 = sadd.s32 4294967295, %s482_s9   ;;  %s322_s11 = sadd.s32 4294967294, %s482_s9   ;;  %s482_s9 = sphi %s508_s9, %s699_s9   ;;  %s478_s8 = sphi %s506_s8, %s698_s8   ;;  %s474_s7 = sphi %s504_s7, %s697_s7   ;;  %s470_s6 = sphi %s502_s6, %s696_s6  }
   0x6   : > { %s527_s12 = sadd.s32 1, %s482_s9   ;;  %s24_s13 = sadd.s32 1, %s478_s8 }
   0x7   : > { %s21_s14 = ssub.s32 %s482_s9, %s527_s12  ;;  %p31_p0 = scmp.ne.s32.totalorder %s478_s8, %s474_s7 }
   0x8   : > { %p22_p1 = scmp.eq.s32.totalorder %s21_s14, 0  ;;  %p32_p2 = scmp.eq.s32.totalorder %s482_s9, 0 }
   0x9   : > { %p37_p3 = scmp.ne.s32.totalorder %s474_s7, %s470_s6  ;;  %p38_p4 = scmp.eq.s32.totalorder %s523_s10, 0 }
   0xa   : > { %s539_s15 = scalar_select %p22_p1, %s478_s8, %s24_s13  }
   0xb   : > { %p541_p5 = por %p32_p2, %p31_p0  ;;  %p545_p6 = por %p38_p4, %p37_p3 }
   0xc   : > { %p61_p7 = scmp.eq.s32.totalorder %s523_s10, 1  ;;  %p67_p8 = scmp.eq.s32.totalorder %s322_s11, 1 }
   0xd   : > { %s687_s17 = scalar_select %p545_p6, 1, 0 }
   0xe   : > { %p350_p10 = scmp.lt.s32.totalorder %s482_s9, 2  ;;  %p552_p11 = por %p61_p7, %p31_p0 }
   0xf   : > { %p556_p12 = por %p67_p8, %p37_p3  ;;  %s87_s20 = sand.u32 1, %s478_s8  }
  0x10   : > { %s688_s18 = scalar_select %p552_p11, 1, 0 }
  0x11   : > { %s689_s19 = scalar_select %p556_p12, 1, 0 }
  0x12   : > { %s335_s21 = sshll.u32 %s482_s9, 8  ;;  %s325_s22 = sshll.u32 %s87_s20, 6 }
  0x13   : > { %s565_s25 = scalar_lea.hbm %s682_s0, %s335_s21  ;;  %s91_s26 = scalar_lea.vmem [#allocation2], %s325_s22 }
  0x14   : > { %s98_s27 = sshll.u32 %s91_s26, 4  ;;  %p569_p13 = pnand %p350_p10, %p541_p5  ;;  %s573_s27 = int_to_ptr.vmem [resolvable:$true] %s98_s27 }
  0x15   : > { %s576_s29 = scalar_lea.sflag [#allocation3], %s87_s20  ;;  %s390_s30 = scalar_lea.hbm %s565_s25, 1024 }
  0x16   : > { %p391_p1 = scmp.ne.s32.totalorder %s565_s25, %s390_s30  ;;  %p392_p2 = pneg %p569_p13 }
  0x17   : > { %s395_s4 = scalar_lea.hbm %s682_s0, 2048  ;;  %p396_p5 = scmp.lt.s32.totalorder %s565_s25, %s682_s0 }
  0x18   : > { %p393_p3 = pnand %p392_p2, %p391_p1  ;;  %p397_p7 = scmp.lt.s32.totalorder %s395_s4, %s390_s30 }
  0x1a   : > { %p394_p4 = pneg %p393_p3  ;;  %p398_p8 = por %p397_p7, %p396_p5 }
  0x1c   : > { %p399_p10 = pnand %p398_p8, %p394_p4 }
  0x1e   : > { %402 = shalt.err (!%p399_p10)
}
  0x1f   : > { %s403_s13 = scalar_lea.vmem %s573_s27, 1024  ;;  %s484_s14 = smov [#allocation2]  }
  0x20   : > { %p404_p9 = scmp.ne.s32.totalorder %s573_s27, %s403_s13  ;;  %s408_s16 = sshll.u32 %s484_s14, 4  ;;  %s409_s16 = int_to_ptr.vmem [resolvable:$false] %s408_s16 }
  0x21   : > { %s410_s20 = scalar_lea.vmem %s409_s16, 2048  ;;  %p411_p3 = scmp.lt.s32.totalorder %s573_s27, %s409_s16 }
  0x22   : > { %p406_p0 = pnand %p404_p9, %p392_p2  ;;  %p412_p12 = scmp.lt.s32.totalorder %s410_s20, %s403_s13 }
  0x24   : > { %p407_p1 = pneg %p406_p0  ;;  %p413_p11 = por %p412_p12, %p411_p3 }
  0x26   : > { %p414_p6 = pnand %p413_p11, %p407_p1 }
  0x28   : > { %417 = shalt.err (!%p414_p6)
}
  0x29   : > { %s485_s21 = smov 512   ;;  %s486_s22 = smov 256  }
  0x2a   : > { %s487_s23 = smov 16   ;;  %p106_p9 = scmp.lt.s32.totalorder %s482_s9, 3 }
  0x2b   : > { %345 = dma.hbm_to_vmem [thread:$0]  (!%p569_p13), %s565_s25, 1024, %s573_s27, %s576_s29, %s485_s21, %s486_s22, %s487_s23  }
  0x2c   : > { %p691_p0 = scmp.ge.s32.totalorder %s482_s9, 1 }
  0x2e   : > { %p107_p2 = pnand %p691_p0, %p106_p9 }
  0x2f   : > { %s601_s24 = sand.u32 (!%p107_p2), 1, %s474_s7   ;;  %p692_p6 = scmp.ne.s32.totalorder (!%p107_p2), %s687_s17, 0 }
  0x30   : > { %110 = sbr.rel (%p107_p2) target bundleno = 87 (0x57), region = 24  ;;  %s329_s26 = sshll.u32 (!%p107_p2), %s601_s24, 6 }
  0x31   : > { %s113_s30 = scalar_lea.sflag (!%p107_p2), [#allocation3], %s601_s24  ;;  %s605_s2 = scalar_lea.vmem (!%p107_p2), [#allocation2], %s329_s26 }
  0x35   : > { %461 = dma.done.wait (%p692_p6), %s113_s30, 1024  }
  0x36   : > { %463 = vsyncadd (%p692_p6), %s113_s30, 4294966272  ;;  %v182_v0 = vlaneseq  ;;  %s337_s25 = smul.u32 48, %s601_s24  ;;  %v137_v4 = vld [vmem:[%s605_s2] sm:$0x3]  ;;  %v139_v5 = vld [vmem:[%s605_s2] sm:$0xc] }
  0x37   : > { %v141_v6 = vmul.f32 0.5, %v139_v5  ;;  %v140_v7 = vld [vmem:[%s605_s2 + $0x8] sm:$0xc]  ;;  %v330_v8 = vld [vmem:[%s605_s2 + $0x4] ss:$8 sm:$0x3] }
  0x38   : > { %v183_v1 = vshrl.u32 %v182_v0, 7  ;;  %v142_v9 = vmul.f32 0.5, %v140_v7  ;;  %v173_v10 = vld [vmem:[%s605_s2] sm:$0xe0]  ;;  %v175_v11 = vld [vmem:[%s605_s2 + $0x10] sm:$0xff]  ;;  %vm208_vm0 = vcmask 1046528  }
  0x39   : > { %v174_v13 = vld [vmem:[%s605_s2 + $0x8] sm:$0xe0]  ;;  %v145_v15 = vrot.slane %v141_v6, 2  ;;  %v138_v16 = vld [vmem:[%s605_s2 + $0x8] sm:$0x3]  ;;  %v176_v17 = vld [vmem:[%s605_s2 + $0x18] sm:$0xff] }
  0x3a   : > { %v184_v2 = vsub.s32 0, %v183_v1  ;;  %v188_v3 = vsub.s32 1, %v183_v1  ;;  %v177_v18 = vld [vmem:[%s605_s2 + $0x20] sm:$0xff]  ;;  %v146_v19 = vrot.slane %v142_v9, 2  ;;  %v178_v31 = vld [vmem:[%s605_s2 + $0x28] sm:$0xff]  ;;  %s134_s17 = scalar_lea.vmem [#allocation5], %s337_s25 }
  0x3b   : > { %v149_v23 = vsub.f32 %v137_v4, %v145_v15  ;;  %v157_v24 = vadd.f32 %v145_v15, %v137_v4  ;;  %v179_v36 = vld [vmem:[%s605_s2 + $0x30] sm:$0x1]  ;;  %v180_v41 = vld [vmem:[%s605_s2 + $0x38] sm:$0x1]  ;;  %s336_s27 = sshll.u32 %s523_s10, 8  ;;  %s249_s28 = sshll.u32 %s134_s17, 4  ;;  %s637_s28 = int_to_ptr.vmem [resolvable:$true] %s249_s28 }
  0x3c   : > { %v185_v12 = vrot.slane %v330_v8, %v184_v2  ;;  %v189_v14 = vrot.slane %v330_v8, %v188_v3  ;;  %v150_v27 = vsub.f32 %v138_v16, %v146_v19  ;;  %v158_v28 = vadd.f32 %v146_v19, %v138_v16  ;;  %s635_s4 = scalar_lea.hbm %s683_s1, %s336_s27  ;;  %s236_s10 = scalar_lea.sflag [#allocation4], %s601_s24 }
  0x3d   : > { %v151_v32 = vmax.f32 %v149_v23, 0.0  ;;  %v159_v33 = vmax.f32 %v157_v24, 0.0  ;;  %s418_s5 = scalar_lea.vmem %s637_s28, 768  ;;  %p693_p12 = scmp.ne.s32.totalorder %s688_s18, 0 }
  0x3e   : > { %v192_v20 = vmul.f32 %v185_v12, %v173_v10  ;;  %v194_v21 = vmul.f32 %v185_v12, %v175_v11  ;;  %v193_v22 = vmul.f32 %v189_v14, %v174_v13  ;;  %v195_v25 = vmul.f32 %v189_v14, %v176_v17  ;;  %p419_p11 = scmp.ne.s32.totalorder %s637_s28, %s418_s5  ;;  %s488_s11 = smov [#allocation5]  }
  0x3f   : > { %v196_v26 = vmul.f32 %v185_v12, %v177_v18  ;;  %v152_v37 = vmax.f32 %v150_v27, 0.0  ;;  %v160_v38 = vmax.f32 %v158_v28, 0.0  ;;  %v153_v42 = vmin.f32 %v151_v32, 1.0  ;;  %s422_s13 = sshll.u32 %s488_s11, 4  ;;  %s423_s13 = int_to_ptr.vmem [resolvable:$false] %s422_s13 }
  0x40   : > { %v209_v29 = vrot.slane %v192_v20, 1  ;;  %v210_v30 = vrot.slane %v194_v21, 1  ;;  %v212_v34 = vrot.slane %v193_v22, 1  ;;  %v213_v35 = vrot.slane %v195_v25, 1  ;;  %p420_p13 = pnand %p419_p11, %p693_p12  ;;  %s424_s14 = scalar_lea.vmem %s423_s13, 1536 }
  0x41   : > { %v215_v40 = vrot.slane %v196_v26, 1  ;;  %v161_v43 = vmin.f32 %v159_v33, 1.0  ;;  %v197_v45 = vmul.f32 %v189_v14, %v178_v31  ;;  %v154_v46 = vmin.f32 %v152_v37, 1.0  ;;  %155 = vst [vmem:[%s134_s17] sm:$0x3] %v153_v42  ;;  %p425_p5 = scmp.lt.s32.totalorder %s637_s28, %s423_s13  ;;  %p426_p7 = scmp.lt.s32.totalorder %s424_s14, %s418_s5 }
  0x42   : > { %v211_v39 = vsel %vm208_vm0, %v209_v29, %v210_v30  ;;  %v214_v44 = vsel %vm208_vm0, %v212_v34, %v213_v35  ;;  %v162_v47 = vmin.f32 %v160_v38, 1.0  ;;  %v198_v49 = vmul.f32 %v185_v12, %v179_v36  ;;  %p421_p4 = pneg %p420_p13 }
  0x43   : > { %229 = vst [vmem:[%s134_s17] sm:$0xf0] %v211_v39  ;;  %230 = vst [vmem:[%s134_s17 + $0x8] sm:$0xf0] %v214_v44  ;;  %v216_v48 = vsel %vm208_vm0, %v210_v30, %v215_v40  ;;  %v165_v50 = vrot.slane %v161_v43, 6  ;;  %v217_v51 = vrot.slane %v197_v45, 1  ;;  %v199_v52 = vmul.f32 %v189_v14, %v180_v41  ;;  %p427_p8 = por %p426_p7, %p425_p5 }
  0x44   : > { %231 = vst [vmem:[%s134_s17 + $0x10] sm:$0xff] %v216_v48  ;;  %156 = vst [vmem:[%s134_s17 + $0x8] sm:$0x3] %v154_v46  ;;  %v166_v53 = vrot.slane %v162_v47, 6  ;;  %v219_v54 = vrot.slane %v198_v49, 1 }
  0x45   : > { %169 = vst [vmem:[%s134_s17] sm:$0xc] %v165_v50  ;;  %v218_v55 = vsel %vm208_vm0, %v213_v35, %v217_v51  ;;  %v221_v56 = vrot.slane %v199_v52, 1  ;;  %p428_p10 = pnand %p427_p8, %p421_p4 }
  0x46   : > { %170 = vst [vmem:[%s134_s17 + $0x8] sm:$0xc] %v166_v53  ;;  %232 = vst [vmem:[%s134_s17 + $0x18] sm:$0xff] %v218_v55  ;;  %v220_v57 = vsel %vm208_vm0, %v215_v40, %v219_v54 }
  0x47   : > { %233 = vst [vmem:[%s134_s17 + $0x20] sm:$0xff] %v220_v57  ;;  %v222_v58 = vsel %vm208_vm0, %v217_v51, %v221_v56 }
  0x48   : > { %234 = vst [vmem:[%s134_s17 + $0x28] sm:$0xff] %v222_v58 }
  0x49   : > { %431 = shalt.err (!%p428_p10)
}
  0x4a   : > { %s432_s16 = scalar_lea.hbm %s635_s4, 768  ;;  %s436_s22 = scalar_lea.hbm %s683_s1, 1536 }
  0x4b   : > { %p433_p1 = scmp.ne.s32.totalorder %s635_s4, %s432_s16  ;;  %p437_p0 = scmp.lt.s32.totalorder %s635_s4, %s683_s1 }
  0x4c   : > { %p438_p2 = scmp.lt.s32.totalorder %s436_s22, %s432_s16 }
  0x4d   : > { %p434_p3 = pnand %p433_p1, %p693_p12 }
  0x4e   : > { %p439_p6 = por %p438_p2, %p437_p0 }
  0x4f   : > { %p435_p9 = pneg %p434_p3 }
  0x51   : > { %p440_p11 = pnand %p439_p6, %p435_p9 }
  0x53   : > { %443 = shalt.err (!%p440_p11)
}
  0x54   : > { %s489_s30 = smov 256   ;;  %s490_s2 = smov 512  }
  0x55   : > { %s491_s25 = smov 16  }
  0x56   : > { %340 = dma.vmem_to_hbm [thread:$0]  (%p693_p12), %s637_s28, 768, %s635_s4, %s236_s10, %s489_s30, %s490_s2, %s491_s25  }
  0x57 PF: > { %s264_s17 = sand.u32 1, %s470_s6   ;;  %p694_p13 = scmp.ne.s32.totalorder %s689_s19, 0 }
  0x58   : > { %p695_p4 = scmp.ge.s32.totalorder %s482_s9, 2  ;;  %s265_s27 = scalar_lea.sflag [#allocation4], %s264_s17 }
  0x5a   : > { %p347_p5 = pnand %p695_p4, %p694_p13 }
  0x5c   : > { %p348_p7 = pneg %p347_p5 }
  0x5e   : > { %465 = dma.done.wait (%p348_p7), %s265_s27, 768  }
  0x5f   : > { %467 = vsyncadd (%p348_p7), %s265_s27, 4294966528  ;;  %p14_p8 = scmp.ge.s32.totalorder %s527_s12, 4   ;;  %s696_s6 = smov %s474_s7 }
  0x60   : > { %s697_s7 = smov %s478_s8  ;;  %s698_s8 = smov %s539_s15 }
  0x61   : > { %s699_s9 = smov %s527_s12  ;;  %16 = sbr.rel (!%p14_p8) target bundleno = 5 (0x5), region = 70 }
  0x66   :  { %270 = vsyncpa [#allocation3], 1 }
  0x67   :  { %272 = vsyncpa [#allocation3 + $0x1], 1 }
  0x68   :  { %273 = vsyncpa [#allocation4], 1 }
  0x69   :  { %275 = vsyncpa [#allocation4 + $0x1], 1 }

</bundles_post_ra>
